<compile_context>
chip_gen: v7x
topology: tpu7x:2x2x1
jax: 0.10.0
libtpu: 0.0.40
codegen_flags: <defaults>
</compile_context>

<pallas_src>
import jax
import jax.numpy as jnp
from jax.experimental import pallas as pl
from jax.experimental.pallas import tpu as pltpu


def _round_up(x, m):
    return ((x + m - 1) // m) * m


def _critic_kernel(emb_ref, mask_ref, wm_ref, bm_ref, wvt_ref, bv_ref, eps_ref,
                   out_ref, acc_v, acc_m):
    """One (batch_tile, seq_tile) step of the fused Critic forward.

    emb_ref  : [TB, TS, Hp]  (bf16 or f32)  token embeddings tile
    mask_ref : [TB, TS, 1]   f32            reduction mask tile
    wm_ref   : [Hp, Hp]      (bf16 or f32)  model dense weight
    bm_ref   : [1, Hp]       f32            model dense bias
    wvt_ref  : [Hp, 1]       f32            value head weight (transposed)
    bv_ref   : [1]           f32 (SMEM)     value head bias
    eps_ref  : [1]           f32 (SMEM)     denominator epsilon
    out_ref  : [TB, 1]       f32            per-sequence value (written once)
    acc_v    : [TB, 1]       f32 scratch    sum_s mask_s * value_s
    acc_m    : [TB, 1]       f32 scratch    sum_s mask_s
    """
    sid = pl.program_id(1)

    @pl.when(sid == 0)
    def _():
        acc_v[...] = jnp.zeros_like(acc_v)
        acc_m[...] = jnp.zeros_like(acc_m)

    tb, ts, hp = emb_ref.shape
    # Flat 2-D matmul: one [TB*TS, Hp] x [Hp, Hp] MXU call (f32 accumulation).
    emb2d = emb_ref[...].reshape(tb * ts, hp)
    hidden = jnp.tanh(
        jnp.dot(emb2d, wm_ref[...], preferred_element_type=jnp.float32)
        + bm_ref[...].astype(jnp.float32)
    )                                                    # [TB*TS, Hp] f32

    # Value head folded into the MXU: a skinny [TB*TS, Hp] x [Hp, 1] matmul
    # (~1/Hp extra MXU work) instead of a [TB,TS,Hp] VPU broadcast-multiply
    # plus an XLU lane reduce per grid step.
    v = jnp.dot(hidden, wvt_ref[...],
                preferred_element_type=jnp.float32)      # [TB*TS, 1]
    v = v.reshape(tb, ts, 1)

    mask = mask_ref[...]                                 # [TB, TS, 1] f32
    acc_v[...] += jnp.sum(v * mask, axis=1)              # [TB, 1]
    acc_m[...] += jnp.sum(mask, axis=1)                  # [TB, 1]

    @pl.when(sid == pl.num_programs(1) - 1)
    def _():
        m_sum = acc_m[...]                               # [TB, 1]
        # values = v + bv, so sum(mask*values) = acc_v + bv * sum(mask).
        out_ref[...] = (acc_v[...] + bv_ref[0] * m_sum) / (m_sum + eps_ref[0])


def _seq_tiling(S, tile_s_cap):
    """Pick (tile_s, S_pad) minimizing padding under the tile cap."""
    s8 = _round_up(S, 8)
    if s8 <= tile_s_cap:
        return s8, s8, 1
    n_t = -(-S // tile_s_cap)
    tile_s = _round_up(-(-S // n_t), 128)
    return tile_s, n_t * tile_s, n_t


def _vmem_estimate(tile_b, tile_s, h_pad, cdt_bytes):
    emb = 2 * tile_b * tile_s * h_pad * cdt_bytes        # double-buffered emb
    mask = 2 * tile_b * tile_s * 128 * 4                 # lane-padded mask tile
    wm = 2 * h_pad * h_pad * cdt_bytes                   # pipelined wm copies
    hid = tile_b * tile_s * h_pad * 4                    # f32 hidden intermediate
    small = 4 * h_pad * 4 * 2 + 4 * max(tile_b, 8) * 128 * 4
    return emb + mask + wm + hid + small


def critic_forward(params, sequences, action_mask=None, attention_mask=None,
                   use_action_mask=False, *, compute_dtype=jnp.bfloat16,
                   tile_s_max=256, vmem_budget_bytes=40 * (1 << 20)):
    """Mirrors Critic.forward. Returns value of shape [B].

    compute_dtype    : dtype of the matmul inputs (emb stream, wm). bf16 (default)
                       halves HBM traffic and uses the native MXU rate; the
                       accumulation and all mask/mean math stay f32.
    tile_s_max       : max sequence-tile length (auto-shrunk to fit the budget).
    vmem_budget_bytes: per-generation VMEM budget used to size tiles (default is
                       conservative enough for v7x's 64 MiB; raise on v5e/v6e to
                       push tile_s to 512-1024 when HBM-bound).
    """
    emb_table, wm, bm, wv, bv = params
    B, S = sequences.shape
    V, H = emb_table.shape
    cdt_bytes = jnp.dtype(compute_dtype).itemsize

    # ---- build the reduction mask & eps (cheap, [B,S]) ----
    col = jnp.arange(S, dtype=jnp.int32)[None, :]
    if action_mask is not None and use_action_mask:
        num_actions = action_mask.shape[1]
        if attention_mask is None:
            attention_mask = jnp.ones((B, S), jnp.float32)
        # prompt_mask = attention_mask[:, :-num_actions] applied to
        # values[:, :-num_actions], expressed as a full-length mask.
        mask = attention_mask.astype(jnp.float32) * (
            col < S - num_actions).astype(jnp.float32)
        eps = 1e-8
    else:
        # values[:, :-1].mean(dim=1) == masked sum / (S - 1), eps = 0 (exact).
        # (S == 1 gives 0/0 == NaN, matching the reference's empty mean.)
        mask = jnp.broadcast_to((col < S - 1).astype(jnp.float32), (B, S))
        eps = 0.0

    # ---- tile sizing (lane-dense H, padding-minimizing S, VMEM-budgeted) ----
    H_pad = _round_up(H, 128)
    if B >= 8:
        tile_b = 8
        B_pad = _round_up(B, 8)
    else:
        tile_b = B
        B_pad = B

    tile_s_cap = max(8, _round_up(tile_s_max, 8))
    while True:
        tile_s, S_pad, _ = _seq_tiling(S, tile_s_cap)
        est = _vmem_estimate(tile_b, tile_s, H_pad, cdt_bytes)
        if est <= vmem_budget_bytes or tile_s_cap <= 128:
            break
        tile_s_cap //= 2
    vmem_limit = int(min(max(est * 1.3 + (2 << 20), 32 << 20), 100 << 20))

    # ---- single-pass padded gather (no f32 round trip, no extra pad copy) ----
    table_p = jnp.zeros((V + 1, H_pad), compute_dtype).at[:V, :H].set(
        emb_table.astype(compute_dtype))                      # row V == zeros
    seq_p = jnp.full((B_pad, S_pad), V, jnp.int32).at[:B, :S].set(
        sequences.astype(jnp.int32))
    emb_p = jnp.take(table_p, seq_p, axis=0)                  # [B_pad,S_pad,H_pad]

    mask_p = jnp.zeros((B_pad, S_pad, 1), jnp.float32).at[:B, :S, 0].set(mask)
    wm_p = jnp.zeros((H_pad, H_pad), compute_dtype).at[:H, :H].set(
        wm.astype(compute_dtype))
    bm_p = jnp.zeros((1, H_pad), jnp.float32).at[:, :H].set(
        bm.astype(jnp.float32).reshape(1, H))
    wvt_p = jnp.zeros((H_pad, 1), jnp.float32).at[:H, 0].set(
        wv.astype(jnp.float32).reshape(-1))
    bv_s = jnp.reshape(bv, (-1,))[:1].astype(jnp.float32)     # (1,) SMEM
    eps_s = jnp.full((1,), eps, jnp.float32)                  # (1,) SMEM

    grid = (B_pad // tile_b, S_pad // tile_s)

    out = pl.pallas_call(
        _critic_kernel,
        out_shape=jax.ShapeDtypeStruct((B_pad, 1), jnp.float32),
        grid_spec=pltpu.PrefetchScalarGridSpec(
            num_scalar_prefetch=0,
            grid=grid,
            in_specs=[
                pl.BlockSpec((tile_b, tile_s, H_pad),
                             lambda bi, si: (bi, si, 0)),          # emb tiles
                pl.BlockSpec((tile_b, tile_s, 1),
                             lambda bi, si: (bi, si, 0)),          # mask tiles
                pl.BlockSpec((H_pad, H_pad), lambda bi, si: (0, 0)),  # wm
                pl.BlockSpec((1, H_pad), lambda bi, si: (0, 0)),      # bm
                pl.BlockSpec((H_pad, 1), lambda bi, si: (0, 0)),      # wv^T
                pl.BlockSpec(memory_space=pltpu.MemorySpace.SMEM),    # bv
                pl.BlockSpec(memory_space=pltpu.MemorySpace.SMEM),    # eps
            ],
            out_specs=pl.BlockSpec((tile_b, 1), lambda bi, si: (bi, 0)),
            scratch_shapes=[
                pltpu.VMEM((tile_b, 1), jnp.float32),   # acc_v
                pltpu.VMEM((tile_b, 1), jnp.float32),   # acc_m
            ],
        ),
        compiler_params=pltpu.CompilerParams(
            dimension_semantics=("parallel", "arbitrary"),
            vmem_limit_bytes=vmem_limit,
        ),
    )(emb_p, mask_p, wm_p, bm_p, wvt_p, bv_s, eps_s)
    return out[:B, 0]


def _reference_forward(params, sequences, action_mask=None, attention_mask=None,
                       use_action_mask=False):
    """Pure-JAX reference of the same forward pass (mirrors the PyTorch code)."""
    emb_table, wm, bm, wv, bv = params
    B, S = sequences.shape
    emb = emb_table[sequences].astype(jnp.float32)
    hidden = jnp.tanh(emb @ wm + bm)                          # last_hidden_state
    values = jnp.sum(hidden * wv, axis=-1) + bv[0, 0]         # [B, S]
    if action_mask is not None and use_action_mask:
        num_actions = action_mask.shape[1]
        prompt_mask = attention_mask[:, : S - num_actions].astype(jnp.float32)
        v = values[:, : S - num_actions]
        return (v * prompt_mask).sum(axis=1) / (prompt_mask.sum(axis=1) + 1e-8)
    return values[:, :-1].mean(axis=1)


if __name__ == "__main__":
    B, S, H, V = 2, 8, 32, 50
    NUM_ACTIONS = 3

    key = jax.random.PRNGKey(0)
    k_emb, k_wm, k_wv, k_seq, k_att = jax.random.split(key, 5)

    emb_table = jax.random.normal(k_emb, (V, H), jnp.float32) * 0.02
    wm = jax.random.normal(k_wm, (H, H), jnp.float32) / jnp.sqrt(H)
    bm = jnp.zeros((1, H), jnp.float32)
    wv = jax.random.normal(k_wv, (1, H), jnp.float32) / jnp.sqrt(H)
    bv = jnp.full((1, 1), 0.1, jnp.float32)
    params = (emb_table, wm, bm, wv, bv)

    sequences = jax.random.randint(k_seq, (B, S), 0, V, dtype=jnp.int32)
    attention_mask = jnp.ones((B, S), jnp.float32)
    action_mask = jnp.ones((B, NUM_ACTIONS), jnp.float32)

    # Path 1: f32 compute, default (use_action_mask=False) -> values[:, :-1].mean
    v_plain = critic_forward(params, sequences, attention_mask=attention_mask,
                             compute_dtype=jnp.float32)
    v_plain = jax.block_until_ready(v_plain)
    v_plain_ref = _reference_forward(params, sequences,
                                     attention_mask=attention_mask)

    # Path 2: f32 compute, masked_mean over the prompt (use_action_mask=True)
    v_masked = critic_forward(params, sequences, action_mask=action_mask,
                              attention_mask=attention_mask,
                              use_action_mask=True,
                              compute_dtype=jnp.float32)
    v_masked = jax.block_until_ready(v_masked)
    v_masked_ref = _reference_forward(params, sequences, action_mask=action_mask,
                                      attention_mask=attention_mask,
                                      use_action_mask=True)

    assert v_plain.shape == (B,) and v_masked.shape == (B,)
    assert jnp.allclose(v_plain, v_plain_ref, atol=1e-5, rtol=1e-5)
    assert jnp.allclose(v_masked, v_masked_ref, atol=1e-5, rtol=1e-5)

    # Path 3: default bf16 matmul inputs (f32 accumulation) — looser tolerance.
    v_bf16_plain = critic_forward(params, sequences,
                                  attention_mask=attention_mask)
    v_bf16_masked = critic_forward(params, sequences, action_mask=action_mask,
                                   attention_mask=attention_mask,
                                   use_action_mask=True)
    v_bf16_plain = jax.block_until_ready(v_bf16_plain)
    v_bf16_masked = jax.block_until_ready(v_bf16_masked)
    assert jnp.allclose(v_bf16_plain, v_plain_ref, atol=2e-2, rtol=2e-2)
    assert jnp.allclose(v_bf16_masked, v_masked_ref, atol=2e-2, rtol=2e-2)

    print("KERNEL_OK")
</pallas_src>

<mosaic_0001>
module attributes {stable_mosaic.version = 11 : i64} {
  func.func @_critic_kernel(%arg0: i32, %arg1: i32, %arg2: memref<2x8x128xf32, #tpu.memory_space<vmem>>, %arg3: memref<2x8x1xf32, #tpu.memory_space<vmem>>, %arg4: memref<128x128xf32, #tpu.memory_space<vmem>>, %arg5: memref<1x128xf32, #tpu.memory_space<vmem>>, %arg6: memref<128x1xf32, #tpu.memory_space<vmem>>, %arg7: memref<1xf32, #tpu.memory_space<smem>>, %arg8: memref<1xf32, #tpu.memory_space<smem>>, %arg9: memref<2x1xf32, #tpu.memory_space<vmem>>, %arg10: memref<2x1xf32, #tpu.memory_space<vmem>>, %arg11: memref<2x1xf32, #tpu.memory_space<vmem>>) attributes {dimension_semantics = [#tpu.dimension_semantics<parallel>, #tpu.dimension_semantics<arbitrary>], iteration_bounds = array<i64: 1, 1>, scalar_prefetch = 0 : i64, scratch_operands = 2 : i64, tpu.core_type = #tpu.core_type<tc>, window_params = [{transform_indices = @transform_0, window_bounds = array<i64: 2, 8, 128>}, {transform_indices = @transform_1, window_bounds = array<i64: 2, 8, 1>}, {pipeline_mode = #tpu.pipeline_mode<synchronous>, transform_indices = @transform_2, window_bounds = array<i64: 128, 128>}, {pipeline_mode = #tpu.pipeline_mode<synchronous>, transform_indices = @transform_3, window_bounds = array<i64: 1, 128>}, {pipeline_mode = #tpu.pipeline_mode<synchronous>, transform_indices = @transform_4, window_bounds = array<i64: 128, 1>}, {transform_indices = @transform_5, window_bounds = array<i64: 1>}, {transform_indices = @transform_6, window_bounds = array<i64: 1>}, {transform_indices = @transform_7, window_bounds = array<i64: 2, 1>}]} {
    %c0_i32 = arith.constant 0 : i32
    %0 = arith.cmpi eq, %arg1, %c0_i32 : i32
    %1 = arith.extui %0 : i1 to i32
    %c0_i32_0 = arith.constant 0 : i32
    %2 = arith.cmpi ne, %1, %c0_i32_0 : i32
    scf.if %2 {
      %cst_25 = arith.constant 0.000000e+00 : f32
      %27 = vector.broadcast %cst_25 : f32 to vector<2x1xf32>
      %c0_26 = arith.constant 0 : index
      %c0_27 = arith.constant 0 : index
      %28 = vector.load %arg10[%c0_26, %c0_27] : memref<2x1xf32, #tpu.memory_space<vmem>>, vector<2x1xf32>
      tpu.vector_store %arg10[%c0_26, %c0_27], %27 {strides = array<i32>} : memref<2x1xf32, #tpu.memory_space<vmem>>, vector<2x1xf32>,
      %cst_28 = arith.constant 0.000000e+00 : f32
      %29 = vector.broadcast %cst_28 : f32 to vector<2x1xf32>
      %c0_29 = arith.constant 0 : index
      %c0_30 = arith.constant 0 : index
      %30 = vector.load %arg11[%c0_29, %c0_30] : memref<2x1xf32, #tpu.memory_space<vmem>>, vector<2x1xf32>
      tpu.vector_store %arg11[%c0_29, %c0_30], %29 {strides = array<i32>} : memref<2x1xf32, #tpu.memory_space<vmem>>, vector<2x1xf32>,
    } else {
    }
    %c0 = arith.constant 0 : index
    %c0_1 = arith.constant 0 : index
    %c0_2 = arith.constant 0 : index
    %3 = vector.load %arg2[%c0, %c0_1, %c0_2] : memref<2x8x128xf32, #tpu.memory_space<vmem>>, vector<2x8x128xf32>
    %4 = vector.shape_cast %3 : vector<2x8x128xf32> to vector<16x128xf32>
    %c0_3 = arith.constant 0 : index
    %c0_4 = arith.constant 0 : index
    %5 = vector.load %arg4[%c0_3, %c0_4] : memref<128x128xf32, #tpu.memory_space<vmem>>, vector<128x128xf32>
    %cst = arith.constant dense<0.000000e+00> : vector<16x128xf32>
    %6 = tpu.matmul %4, %5, %cst {dimension_numbers = #tpu.dot_dimension_numbers<[1], [0], [0], [1], [0, 0, 1, 1], [], []>} : vector<16x128xf32>, vector<128x128xf32>, vector<16x128xf32> -> vector<16x128xf32>
    %c0_5 = arith.constant 0 : index
    %c0_6 = arith.constant 0 : index
    %7 = vector.load %arg5[%c0_5, %c0_6] : memref<1x128xf32, #tpu.memory_space<vmem>>, vector<1x128xf32>
    %8 = vector.broadcast %7 : vector<1x128xf32> to vector<16x128xf32>
    %9 = arith.addf %6, %8 : vector<16x128xf32>
    %10 = math.tanh %9 : vector<16x128xf32>
    %c0_7 = arith.constant 0 : index
    %c0_8 = arith.constant 0 : index
    %11 = vector.load %arg6[%c0_7, %c0_8] : memref<128x1xf32, #tpu.memory_space<vmem>>, vector<128x1xf32>
    %cst_9 = arith.constant dense<0.000000e+00> : vector<16x1xf32>
    %12 = tpu.matmul %10, %11, %cst_9 {dimension_numbers = #tpu.dot_dimension_numbers<[1], [0], [0], [1], [0, 0, 1, 1], [], []>} : vector<16x128xf32>, vector<128x1xf32>, vector<16x1xf32> -> vector<16x1xf32>
    %13 = vector.shape_cast %12 : vector<16x1xf32> to vector<2x8x1xf32>
    %c0_10 = arith.constant 0 : index
    %c0_11 = arith.constant 0 : index
    %c0_12 = arith.constant 0 : index
    %14 = vector.load %arg3[%c0_10, %c0_11, %c0_12] : memref<2x8x1xf32, #tpu.memory_space<vmem>>, vector<2x8x1xf32>
    %c0_13 = arith.constant 0 : index
    %c0_14 = arith.constant 0 : index
    %15 = vector.load %arg10[%c0_13, %c0_14] : memref<2x1xf32, #tpu.memory_space<vmem>>, vector<2x1xf32>
    %16 = arith.mulf %13, %14 : vector<2x8x1xf32>
    %cst_15 = arith.constant dense<0.000000e+00> : vector<2x1xf32>
    %17 = vector.multi_reduction <add>, %16, %cst_15 [1] : vector<2x8x1xf32> to vector<2x1xf32>
    %18 = arith.addf %15, %17 : vector<2x1xf32>
    %c0_16 = arith.constant 0 : index
    %c0_17 = arith.constant 0 : index
    %19 = vector.load %arg10[%c0_16, %c0_17] : memref<2x1xf32, #tpu.memory_space<vmem>>, vector<2x1xf32>
    tpu.vector_store %arg10[%c0_16, %c0_17], %18 {strides = array<i32>} : memref<2x1xf32, #tpu.memory_space<vmem>>, vector<2x1xf32>,
    %c0_18 = arith.constant 0 : index
    %c0_19 = arith.constant 0 : index
    %20 = vector.load %arg11[%c0_18, %c0_19] : memref<2x1xf32, #tpu.memory_space<vmem>>, vector<2x1xf32>
    %cst_20 = arith.constant dense<0.000000e+00> : vector<2x1xf32>
    %21 = vector.multi_reduction <add>, %14, %cst_20 [1] : vector<2x8x1xf32> to vector<2x1xf32>
    %22 = arith.addf %20, %21 : vector<2x1xf32>
    %c0_21 = arith.constant 0 : index
    %c0_22 = arith.constant 0 : index
    %23 = vector.load %arg11[%c0_21, %c0_22] : memref<2x1xf32, #tpu.memory_space<vmem>>, vector<2x1xf32>
    tpu.vector_store %arg11[%c0_21, %c0_22], %22 {strides = array<i32>} : memref<2x1xf32, #tpu.memory_space<vmem>>, vector<2x1xf32>,
    %c0_i32_23 = arith.constant 0 : i32
    %24 = arith.cmpi eq, %arg1, %c0_i32_23 : i32
    %25 = arith.extui %24 : i1 to i32
    %c0_i32_24 = arith.constant 0 : i32
    %26 = arith.cmpi ne, %25, %c0_i32_24 : i32
    scf.if %26 {
      %c0_25 = arith.constant 0 : index
      %c0_26 = arith.constant 0 : index
      %27 = vector.load %arg11[%c0_25, %c0_26] : memref<2x1xf32, #tpu.memory_space<vmem>>, vector<2x1xf32>
      %c0_27 = arith.constant 0 : index
      %c0_28 = arith.constant 0 : index
      %28 = vector.load %arg10[%c0_27, %c0_28] : memref<2x1xf32, #tpu.memory_space<vmem>>, vector<2x1xf32>
      %c0_29 = arith.constant 0 : index
      %29 = memref.load %arg7[%c0_29] : memref<1xf32, #tpu.memory_space<smem>>
      %30 = vector.broadcast %29 : f32 to vector<2x1xf32>
      %31 = arith.mulf %30, %27 : vector<2x1xf32>
      %32 = arith.addf %28, %31 : vector<2x1xf32>
      %c0_30 = arith.constant 0 : index
      %33 = memref.load %arg8[%c0_30] : memref<1xf32, #tpu.memory_space<smem>>
      %34 = vector.broadcast %33 : f32 to vector<2x1xf32>
      %35 = arith.addf %27, %34 : vector<2x1xf32>
      %36 = arith.divf %32, %35 : vector<2x1xf32>
      %c0_31 = arith.constant 0 : index
      %c0_32 = arith.constant 0 : index
      %37 = vector.load %arg9[%c0_31, %c0_32] : memref<2x1xf32, #tpu.memory_space<vmem>>, vector<2x1xf32>
      tpu.vector_store %arg9[%c0_31, %c0_32], %36 {strides = array<i32>} : memref<2x1xf32, #tpu.memory_space<vmem>>, vector<2x1xf32>,
    } else {
    }
    return
  }
  func.func @transform_0(%arg0: i32, %arg1: i32) -> (i32, i32, i32) {
    %c0_i32 = arith.constant 0 : i32
    %c0_i32_0 = arith.constant 0 : i32
    return %arg0, %arg1, %c0_i32 : i32, i32, i32
  }
  func.func @transform_1(%arg0: i32, %arg1: i32) -> (i32, i32, i32) {
    %c0_i32 = arith.constant 0 : i32
    %c0_i32_0 = arith.constant 0 : i32
    return %arg0, %arg1, %c0_i32 : i32, i32, i32
  }
  func.func @transform_2(%arg0: i32, %arg1: i32) -> (i32, i32) {
    %c0_i32 = arith.constant 0 : i32
    %c0_i32_0 = arith.constant 0 : i32
    %c0_i32_1 = arith.constant 0 : i32
    return %c0_i32, %c0_i32_0 : i32, i32
  }
  func.func @transform_3(%arg0: i32, %arg1: i32) -> (i32, i32) {
    %c0_i32 = arith.constant 0 : i32
    %c0_i32_0 = arith.constant 0 : i32
    %c0_i32_1 = arith.constant 0 : i32
    return %c0_i32, %c0_i32_0 : i32, i32
  }
  func.func @transform_4(%arg0: i32, %arg1: i32) -> (i32, i32) {
    %c0_i32 = arith.constant 0 : i32
    %c0_i32_0 = arith.constant 0 : i32
    %c0_i32_1 = arith.constant 0 : i32
    return %c0_i32, %c0_i32_0 : i32, i32
  }
  func.func @transform_5(%arg0: i32, %arg1: i32) -> i32 {
    %c0_i32 = arith.constant 0 : i32
    %c0_i32_0 = arith.constant 0 : i32
    return %c0_i32 : i32
  }
  func.func @transform_6(%arg0: i32, %arg1: i32) -> i32 {
    %c0_i32 = arith.constant 0 : i32
    %c0_i32_0 = arith.constant 0 : i32
    return %c0_i32 : i32
  }
  func.func @transform_7(%arg0: i32, %arg1: i32) -> (i32, i32) {
    %c0_i32 = arith.constant 0 : i32
    %c0_i32_0 = arith.constant 0 : i32
    return %arg0, %c0_i32 : i32, i32
  }
}

</mosaic_0001>

<bundles_post_ra>
// kernel: tpu_custom_call.1
= control target key start
LH: loop header
LB: loop body
LE: loop exit
PB: predicated region body
PF: predicated region fallthrough
CT: control target
= control target key end

     0   :  { %vm233_vm0 = vcmask 7168   ;;  %vm32_vm1 = vcmask 1024   ;;  %vm250_vm2 = vcmask 1041409   ;;  %s646_s2 = inlined_call_operand.vmem [shape: f32[128,128], index: 2, kind: input, shape index: {}]   ;;  %s647_s0 = inlined_call_operand.vmem [shape: f32[2,8,128], index: 0, kind: input, shape index: {}]   ;;  %s648_s4 = inlined_call_operand.vmem [shape: f32[128,1], index: 4, kind: input, shape index: {}]   ;;  %s649_s3 = inlined_call_operand.vmem [shape: f32[1,128], index: 3, kind: input, shape index: {}]   ;;  %s650_s1 = inlined_call_operand.vmem [shape: f32[2,8,1], index: 1, kind: input, shape index: {}]   ;;  %s651_s6 = inlined_call_operand.<no memory space> [shape: f32[1], index: 6, kind: input, shape index: {}]   ;;  %s652_s5 = inlined_call_operand.<no memory space> [shape: f32[1], index: 5, kind: input, shape index: {}]   ;;  %s653_s7 = inlined_call_operand.vmem [shape: f32[2,1], index: 7, kind: output, shape index: {}]  }
   0x1   :  { %v37_v0 = vld [vmem:[%s646_s2] sm:$0xff]  ;;  %v38_v1 = vld [vmem:[%s646_s2 + $0x8] sm:$0xff]  ;;  %v39_v2 = vld [vmem:[%s646_s2 + $0x10] sm:$0xff] }
   0x2   :  { %v403_v3 = vpack.c.bf16 %v38_v1, %v37_v0  ;;  %v40_v4 = vld [vmem:[%s646_s2 + $0x18] sm:$0xff]  ;;  %v41_v6 = vld [vmem:[%s646_s2 + $0x20] sm:$0xff]  ;;  %v42_v7 = vld [vmem:[%s646_s2 + $0x28] sm:$0xff] }
   0x3   :  { %v407_v5 = vpack.c.bf16 %v40_v4, %v39_v2  ;;  %v411_v8 = vpack.c.bf16 %v42_v7, %v41_v6  ;;  %v43_v9 = vld [vmem:[%s646_s2 + $0x30] sm:$0xff]  ;;  %v44_v10 = vld [vmem:[%s646_s2 + $0x38] sm:$0xff]  ;;  %v35_v11 = vld [vmem:[%s647_s0] sm:$0xff] }
   0x4   :  { %404 = vmatprep.subr.bf16.mxu0 %v403_v3  ;;  %365 = vmatprep.mubr.f32.mxu0 %v35_v11  ;;  %v137_v12 = vld [vmem:[%s648_s4] sm:$0xff]  ;;  %v138_v13 = vld [vmem:[%s648_s4 + $0x8] sm:$0xff]  ;;  %v139_v14 = vld [vmem:[%s648_s4 + $0x10] sm:$0xff]  ;;  %v415_v20 = vpack.c.bf16 %v44_v10, %v43_v9 }
   0x5   :  { %406 = vmatpush3.bf16.msra.mxu0 %v403_v3  ;;  %v435_v15 = vpack.c.bf16 %v138_v13, %v137_v12  ;;  %v140_v16 = vld [vmem:[%s648_s4 + $0x18] sm:$0xff]  ;;  %v141_v18 = vld [vmem:[%s648_s4 + $0x20] sm:$0xff]  ;;  %v142_v19 = vld [vmem:[%s648_s4 + $0x28] sm:$0xff]  ;;  %v474_v3 = vmov 0.0  }
   0x6   :  { %408 = vmatprep.subr.bf16.mxu0 %v407_v5  ;;  %v439_v17 = vpack.c.bf16 %v140_v16, %v139_v14  ;;  %v45_v21 = vld [vmem:[%s646_s2 + $0x40] sm:$0xff]  ;;  %v46_v22 = vld [vmem:[%s646_s2 + $0x48] sm:$0xff]  ;;  %v443_v23 = vpack.c.bf16 %v142_v19, %v141_v18  ;;  %v143_v24 = vld [vmem:[%s648_s4 + $0x30] sm:$0xff]  ;;  %33 = vst.msk [vmem:[#allocation2] sm:$0x3] %vm32_vm1, %v474_v3 }
   0x7   :  { %436 = vmatprep.subr.bf16.mxu1 %v435_v15  ;;  %v144_v25 = vld [vmem:[%s648_s4 + $0x38] sm:$0xff]  ;;  %v419_v26 = vpack.c.bf16 %v46_v22, %v45_v21  ;;  %v47_v27 = vld [vmem:[%s646_s2 + $0x50] sm:$0xff]  ;;  %v49_v31 = vld [vmem:[%s646_s2 + $0x60] sm:$0xff]  ;;  %34 = vst.msk [vmem:[#allocation3] sm:$0x3] %vm32_vm1, %v474_v3 }
   0x8   :  { %438 = vmatpush3.bf16.msra.mxu1 %v435_v15  ;;  %v48_v28 = vld [vmem:[%s646_s2 + $0x58] sm:$0xff]  ;;  %v447_v29 = vpack.c.bf16 %v144_v25, %v143_v24  ;;  %v50_v32 = vld [vmem:[%s646_s2 + $0x68] sm:$0xff]  ;;  %v51_v34 = vld [vmem:[%s646_s2 + $0x70] sm:$0xff] }
   0x9   :  { %410 = vmatpush3.bf16.msra.mxu0 %v407_v5  ;;  %440 = vmatprep.subr.bf16.mxu1 %v439_v17  ;;  %v423_v30 = vpack.c.bf16 %v48_v28, %v47_v27  ;;  %v427_v33 = vpack.c.bf16 %v50_v32, %v49_v31  ;;  %v52_v35 = vld [vmem:[%s646_s2 + $0x78] sm:$0xff]  ;;  %v36_v37 = vld [vmem:[%s647_s0 + $0x8] sm:$0xff]  ;;  %v145_v38 = vld [vmem:[%s648_s4 + $0x40] sm:$0xff]  ;;  %v287_v27 = vstv %s651_s6 }
   0xa   :  { %412 = vmatprep.subr.bf16.mxu0 %v411_v8  ;;  %v431_v36 = vpack.c.bf16 %v52_v35, %v51_v34  ;;  %v146_v39 = vld [vmem:[%s648_s4 + $0x48] sm:$0xff]  ;;  %v147_v41 = vld [vmem:[%s648_s4 + $0x50] sm:$0xff]  ;;  %v148_v42 = vld [vmem:[%s648_s4 + $0x58] sm:$0xff] }
   0xb   :  { %v451_v40 = vpack.c.bf16 %v146_v39, %v145_v38  ;;  %v455_v43 = vpack.c.bf16 %v148_v42, %v147_v41  ;;  %v149_v44 = vld [vmem:[%s648_s4 + $0x60] sm:$0xff]  ;;  %v150_v45 = vld [vmem:[%s648_s4 + $0x68] sm:$0xff]  ;;  %v151_v46 = vld [vmem:[%s648_s4 + $0x70] sm:$0xff] }
   0xc   :  { %442 = vmatpush3.bf16.msra.mxu1 %v439_v17  ;;  %v459_v47 = vpack.c.bf16 %v150_v45, %v149_v44  ;;  %v152_v48 = vld [vmem:[%s648_s4 + $0x78] sm:$0xff]  ;;  %v296_v50 = vld [vmem:[%s649_s3] ss:$0 sm:$0xff]  ;;  %v229_v57 = vld [vmem:[%s650_s1 + $0x8] sm:$0xff] }
   0xd   :  { %414 = vmatpush3.bf16.msra.mxu0 %v411_v8  ;;  %444 = vmatprep.subr.bf16.mxu1 %v443_v23  ;;  %v463_v49 = vpack.c.bf16 %v152_v48, %v151_v46  ;;  %v228_v58 = vld [vmem:[%s650_s1] sm:$0xff]  ;;  %v264_v59 = vsel %vm233_vm0, %v229_v57, 0.0 }
   0xe   :  { %416 = vmatprep.subr.bf16.mxu0 %v415_v20  ;;  %v257_v60 = vsel %vm233_vm0, %v228_v58, 0.0  ;;  %v265_v61 = vrot.slane %v264_v59, 4  ;;  %v256_v10 = vld [vmem:[#allocation3] sm:$0x3] }
   0xf   :  { %v258_v62 = vrot.slane %v257_v60, 4 }
  0x10   :  { %446 = vmatpush3.bf16.msra.mxu1 %v443_v23  ;;  %v266_v63 = vadd.f32 %v265_v61, %v264_v59 }
  0x11   :  { %418 = vmatpush3.bf16.msra.mxu0 %v415_v20  ;;  %448 = vmatprep.subr.bf16.mxu1 %v447_v29  ;;  %v259_v0 = vadd.f32 %v258_v62, %v257_v60 }
  0x12   :  { %420 = vmatprep.subr.bf16.mxu0 %v419_v26  ;;  %v267_v1 = vrot.slane %v266_v63, 2 }
  0x13   :  { %v260_v2 = vrot.slane %v259_v0, 2 }
  0x14   :  { %450 = vmatpush3.bf16.msra.mxu1 %v447_v29  ;;  %v268_v4 = vadd.f32 %v267_v1, %v266_v63 }
  0x15   :  { %422 = vmatpush3.bf16.msra.mxu0 %v419_v26  ;;  %452 = vmatprep.subr.bf16.mxu1 %v451_v40  ;;  %v261_v5 = vadd.f32 %v260_v2, %v259_v0 }
  0x16   :  { %424 = vmatprep.subr.bf16.mxu0 %v423_v30  ;;  %v269_v6 = vrot.slane %v268_v4, 1 }
  0x17   :  { %v262_v7 = vrot.slane %v261_v5, 1 }
  0x18   :  { %454 = vmatpush3.bf16.msra.mxu1 %v451_v40  ;;  %v270_v8 = vadd.f32 %v269_v6, %v268_v4 }
  0x19   :  { %426 = vmatpush3.bf16.msra.mxu0 %v423_v30  ;;  %456 = vmatprep.subr.bf16.mxu1 %v455_v43  ;;  %v263_v9 = vadd.f32 %v262_v7, %v261_v5 }
  0x1a   :  { %428 = vmatprep.subr.bf16.mxu0 %v427_v33 }
  0x1b   :  { %v273_v11 = vsel %vm250_vm2, %v270_v8, %v263_v9 }
  0x1c   :  { %458 = vmatpush3.bf16.msra.mxu1 %v455_v43  ;;  %v275_v12 = vadd.f32 %v273_v11, %v256_v10 }
  0x1d   :  { %430 = vmatpush3.bf16.msra.mxu0 %v427_v33  ;;  %460 = vmatprep.subr.bf16.mxu1 %v459_v47  ;;  %v230_v33 = vld [vmem:[#allocation2] sm:$0x3] }
  0x1e   :  { %432 = vmatprep.subr.bf16.mxu0 %v431_v36  ;;  %276 = vst.msk [vmem:[#allocation3] sm:$0x3] %vm32_vm1, %v275_v12 }
  0x20   :  { %462 = vmatpush3.bf16.msra.mxu1 %v459_v47 }
  0x21   :  { %434 = vmatpush3.bf16.msra.mxu0 %v431_v36  ;;  %464 = vmatprep.subr.bf16.mxu1 %v463_v49 }
  0x24   :  { %366 = vmatmul.mubr.f32.vlgmr.msra.gmra.mrb[0].mxu0 %v36_v37  ;;  %466 = vmatpush3.bf16.msra.mxu1 %v463_v49  ;;  %v283_v37 = vstv %s652_s5 }
  0x25   :  { %v280_v26 = vld [vmem:[#allocation3] sm:$0x3] }
  0x26   :  { %v288_v31 = vadd.f32 %v287_v27, %v280_v26  ;;  %v284_v38 = vmul.f32 %v283_v37, %v280_v26 }
  0xf7   :  { %v367_v51 = vpop.f32.mrb[0].mxu0 }
  0xf8   :  { %v132_v52 = vadd.f32 %v367_v51, %v296_v50  ;;  %v126_v53 = vpop.f32.mrb[1].mxu0 }
  0xf9   :  { %v127_v54 = vadd.f32 %v296_v50, %v126_v53 }
  0xfb   :  { %468 = vtanh.f32 %v127_v54 }
  0xfc   :  { %470 = vtanh.f32 %v132_v52 }
  0xfd   :  { %472 = vrcp.f32 %v288_v31 }
 0x105   :  { %v469_v55 = vpop.eup %468 }
 0x106   :  { %v471_v56 = vpop.eup %470  ;;  %400 = vmatprep.mubr.f32.mxu1 %v469_v55 }
 0x107   :  { %401 = vmatmul.mubr.f32.vlgmr.msra.gmra.mrb[0].mxu1 %v471_v56  ;;  %v473_v39 = vpop.eup %472 }
 0x1da   :  { %v402_v13 = vpop.f32.mrb[0].mxu1 }
 0x1db   :  { %v232_v14 = vmul.f32 %v402_v13, %v229_v57  ;;  %v219_v15 = vpop.f32.mrb[1].mxu1 }
 0x1dc   :  { %v231_v16 = vmul.f32 %v228_v58, %v219_v15 }
 0x1dd   :  { %v241_v17 = vsel %vm233_vm0, %v232_v14, 0.0 }
 0x1de   :  { %v242_v18 = vrot.slane %v241_v17, 4  ;;  %v234_v19 = vsel %vm233_vm0, %v231_v16, 0.0 }
 0x1df   :  { %v235_v20 = vrot.slane %v234_v19, 4 }
 0x1e0   :  { %v243_v21 = vadd.f32 %v242_v18, %v241_v17 }
 0x1e1   :  { %v236_v22 = vadd.f32 %v235_v20, %v234_v19 }
 0x1e2   :  { %v244_v23 = vrot.slane %v243_v21, 2 }
 0x1e3   :  { %v237_v24 = vrot.slane %v236_v22, 2 }
 0x1e4   :  { %v245_v25 = vadd.f32 %v244_v23, %v243_v21 }
 0x1e5   :  { %v238_v28 = vadd.f32 %v237_v24, %v236_v22 }
 0x1e6   :  { %v246_v29 = vrot.slane %v245_v25, 1 }
 0x1e7   :  { %v239_v30 = vrot.slane %v238_v28, 1 }
 0x1e8   :  { %v247_v32 = vadd.f32 %v246_v29, %v245_v25 }
 0x1e9   :  { %v240_v34 = vadd.f32 %v239_v30, %v238_v28 }
 0x1eb   :  { %v251_v35 = vsel %vm250_vm2, %v247_v32, %v240_v34 }
 0x1ec   :  { %v253_v36 = vadd.f32 %v251_v35, %v230_v33 }
 0x1ee   :  { %255 = vst.msk [vmem:[#allocation2] sm:$0x3] %vm32_vm1, %v253_v36 }
 0x1f5   :  { %v281_v40 = vld [vmem:[#allocation2] sm:$0x3] }
 0x1f6   :  { %v285_v41 = vadd.f32 %v284_v38, %v281_v40 }
 0x1f8   :  { %v290_v42 = vmul.f32 %v473_v39, %v285_v41 }
 0x1fa   :  { %291 = vst.msk [vmem:[%s653_s7] sm:$0x3] %vm32_vm1, %v290_v42 }

</bundles_post_ra>
